<compile_context>
chip_gen: v7x
topology: tpu7x:2x2x1
jax: 0.10.0
libtpu: 0.0.40
codegen_flags: <defaults>
</compile_context>

<pallas_src>
import functools
import math

import jax
import jax.numpy as jnp
from jax.experimental import pallas as pl
from jax.experimental.pallas import tpu as pltpu


def _round_up(n, m):
    return (n + m - 1) // m * m


def _estimator_kernel(n_linear, batch, num_actions, x_ref, w_ref, b_ref, out_ref):
    """Single-grid-point fused forward.

    x_ref   : (B_pad, P) f32, rows >= batch and cols >= D are zero-padded.
    w_ref   : (n_linear, P, P) f32, fused (va|ad) block-diagonal weights,
              BN gamma/beta already folded into layer 0.
    b_ref   : (n_linear, 1, P) f32 fused biases.
    out_ref : (B_pad, P) f32; cols [0:num_actions] hold the real result.
    """
    x = x_ref[...]                                            # (B_pad, P)
    b_pad, p = x.shape
    inv_b = jnp.float32(1.0 / batch)

    # --- BatchNorm1d (training-mode batch stats), computed once for BOTH
    # branches.  Padded rows of x are exactly zero, so the sum-based mean is
    # exact; the variance masks the padded rows out.
    row_ids = jax.lax.broadcasted_iota(jnp.int32, (b_pad, p), 0)
    row_mask = (row_ids < batch).astype(jnp.float32)
    mean = jnp.sum(x, axis=0, keepdims=True) * inv_b
    d = (x - mean) * row_mask
    var = jnp.sum(d * d, axis=0, keepdims=True) * inv_b       # biased variance
    h = (x - mean) * jax.lax.rsqrt(var + 1e-5)
    # gamma/beta are folded into w_ref[0] / b_ref[0] by the wrapper.

    # --- fused matmul chain (both branches in one lane-dense (P,P) weight).
    for i in range(n_linear):
        h = jnp.dot(h, w_ref[i], preferred_element_type=jnp.float32) + b_ref[i]
        if i < n_linear - 1:                                  # Tanh on hidden layers only
            h = jnp.tanh(h)

    # --- dueling combine.  Columns [0:num_actions] = va branch, column
    # [num_actions] = ad branch (width 1, so mean(ad, dim=1) == ad).  Apply
    # over the full lane-dense slab (extra columns are sliced off outside).
    ad = h[:, num_actions:num_actions + 1]                    # (B_pad, 1)
    out_ref[...] = (h + ad) - ad                              # == (va + ad) - mean(ad)


def init_params(key, state_dim, mlp_layers, num_actions):
    """Deterministic synthetic parameters (PyTorch-Linear-like uniform init).

    Layout per branch: [gamma(1,D), beta(1,D), W1, b1, ..., Wn, bn] with
    W stored as (in, out).  va branch (num_actions outputs) first, then the
    ad branch (1 output), matching the module's forward.
    """
    layer_dims = [state_dim] + list(mlp_layers)
    params = []
    for out_last in (num_actions, 1):
        key, kg, kb0 = jax.random.split(key, 3)
        gamma = 1.0 + 0.1 * jax.random.normal(kg, (1, state_dim), jnp.float32)
        beta = 0.1 * jax.random.normal(kb0, (1, state_dim), jnp.float32)
        params += [gamma, beta]
        dims = layer_dims + [out_last]
        for i in range(len(dims) - 1):
            key, kw, kb = jax.random.split(key, 3)
            bound = 1.0 / math.sqrt(dims[i])
            w = jax.random.uniform(kw, (dims[i], dims[i + 1]), jnp.float32,
                                   minval=-bound, maxval=bound)
            b = jax.random.uniform(kb, (1, dims[i + 1]), jnp.float32,
                                   minval=-bound, maxval=bound)
            params += [w, b]
    return params


def _pack_params(params, mlp_layers, num_actions, lane_pad):
    """Fold BN affine into layer 0, fuse the two branches block-diagonally,
    zero-pad every fused layer to (lane_pad, lane_pad) and stack into two
    buffers.  Pure parameter math, batch-independent."""
    n_linear = len(mlp_layers) + 1
    per_branch = 2 + 2 * n_linear
    pa, pb = params[:per_branch], params[per_branch:]        # va branch, ad branch

    def branch_mats(p):
        gamma, beta = p[0], p[1]
        ws = [p[2 + 2 * i] for i in range(n_linear)]
        bs = [p[3 + 2 * i] for i in range(n_linear)]
        w0 = gamma.reshape(-1, 1) * ws[0]                    # fold BN scale
        b0 = beta @ ws[0] + bs[0]                            # fold BN shift
        return [w0] + ws[1:], [b0] + bs[1:]

    wa, ba = branch_mats(pa)
    wb, bb = branch_mats(pb)

    fused_w, fused_b = [], []
    for i in range(n_linear):
        if i == 0:
            w = jnp.concatenate([wa[0], wb[0]], axis=1)      # shared normalized input
        else:
            top = jnp.concatenate(
                [wa[i], jnp.zeros((wa[i].shape[0], wb[i].shape[1]), jnp.float32)], axis=1)
            bot = jnp.concatenate(
                [jnp.zeros((wb[i].shape[0], wa[i].shape[1]), jnp.float32), wb[i]], axis=1)
            w = jnp.concatenate([top, bot], axis=0)          # block diagonal
        b = jnp.concatenate([ba[i], bb[i]], axis=1)
        fused_w.append(w)
        fused_b.append(b)

    p = lane_pad
    w_all = jnp.stack([jnp.pad(w, ((0, p - w.shape[0]), (0, p - w.shape[1])))
                       for w in fused_w])                    # (n_linear, P, P)
    b_all = jnp.stack([jnp.pad(b, ((0, 0), (0, p - b.shape[1])))
                       for b in fused_b])                    # (n_linear, 1, P)
    return w_all, b_all


def estimator_forward(s, params, *, mlp_layers, num_actions):
    B = s.shape[0]
    D = int(math.prod(s.shape[1:]))
    n_linear = len(mlp_layers) + 1

    # Lane / sublane padding for a lane-dense kernel.
    P = _round_up(max([D, num_actions + 1] + [2 * h for h in mlp_layers]), 128)
    B_pad = _round_up(B, 8)

    x = s.reshape(B, D).astype(jnp.float32)                  # Flatten (glue, plain JAX)
    x_pad = jnp.zeros((B_pad, P), jnp.float32).at[:B, :D].set(x)

    w_all, b_all = _pack_params(params, mlp_layers, num_actions, P)

    kernel = functools.partial(_estimator_kernel, n_linear, B, num_actions)
    vmem = pl.BlockSpec(memory_space=pltpu.MemorySpace.VMEM)

    flops = 2 * B_pad * P * P * n_linear
    bytes_accessed = 4 * (B_pad * P + n_linear * P * P + n_linear * P + B_pad * P)

    out_pad = pl.pallas_call(
        kernel,
        out_shape=jax.ShapeDtypeStruct((B_pad, P), jnp.float32),
        in_specs=[vmem, vmem, vmem],
        out_specs=vmem,
        cost_estimate=pl.CostEstimate(
            flops=flops,
            transcendentals=B_pad * P * (n_linear - 1),
            bytes_accessed=bytes_accessed),
    )(x_pad, w_all, b_all)

    return out_pad[:B, :num_actions]


def _reference_forward(s, params, *, mlp_layers, num_actions):
    """Pure-JAX reference mirroring the PyTorch forward (un-fused params)."""
    B = s.shape[0]
    D = int(math.prod(s.shape[1:]))
    x = s.reshape(B, D).astype(jnp.float32)
    n_linear = len(mlp_layers) + 1
    per_branch = 2 + 2 * n_linear

    def branch(p):
        gamma, beta = p[0], p[1]
        mean = jnp.mean(x, axis=0, keepdims=True)
        var = jnp.mean((x - mean) ** 2, axis=0, keepdims=True)
        h = (x - mean) / jnp.sqrt(var + 1e-5) * gamma + beta
        for i in range(n_linear):
            h = h @ p[2 + 2 * i] + p[3 + 2 * i]
            if i < n_linear - 1:
                h = jnp.tanh(h)
        return h

    va = branch(params[:per_branch])                         # (B, num_actions)
    ad = branch(params[per_branch:])                         # (B, 1)
    return va + ad - jnp.mean(ad, axis=1, keepdims=True)


if __name__ == "__main__":
    # Shapes consistent with the module: state_shape=[4, 16] -> D=64,
    # mlp_layers=[32, 32], num_actions=2, batch=2.
    num_actions = 2
    state_shape = (4, 16)
    mlp_layers = [32, 32]
    batch = 2

    key = jax.random.PRNGKey(0)
    k_x, k_p = jax.random.split(key)
    s = jax.random.normal(k_x, (batch,) + state_shape, jnp.float32)
    params = init_params(k_p, int(math.prod(state_shape)), mlp_layers, num_actions)

    out = estimator_forward(s, params, mlp_layers=mlp_layers, num_actions=num_actions)
    out = jax.block_until_ready(out)

    ref = _reference_forward(s, params, mlp_layers=mlp_layers, num_actions=num_actions)
    assert out.shape == (batch, num_actions)
    assert jnp.allclose(out, ref, atol=1e-4, rtol=1e-4), (out, ref)

    print("KERNEL_OK")
</pallas_src>

<mosaic_0001>
module attributes {stable_mosaic.version = 11 : i64} {
  func.func @_estimator_kernel(%arg0: memref<8x128xf32, #tpu.memory_space<vmem>>, %arg1: memref<3x128x128xf32, #tpu.memory_space<vmem>>, %arg2: memref<3x1x128xf32, #tpu.memory_space<vmem>>, %arg3: memref<8x128xf32, #tpu.memory_space<vmem>>) attributes {dimension_semantics = [], scalar_prefetch = 0 : i64, scratch_operands = 0 : i64, tpu.core_type = #tpu.core_type<tc>} {
    %c0 = arith.constant 0 : index
    %c0_0 = arith.constant 0 : index
    %0 = vector.load %arg0[%c0, %c0_0] : memref<8x128xf32, #tpu.memory_space<vmem>>, vector<8x128xf32>
    %1 = tpu.iota {dimensions = array<i32: 0>} : vector<8x128xi32>
    %c2_i32 = arith.constant 2 : i32
    %2 = vector.broadcast %c2_i32 : i32 to vector<8x128xi32>
    %3 = arith.cmpi slt, %1, %2 : vector<8x128xi32>
    %4 = arith.extui %3 : vector<8x128xi1> to vector<8x128xi32>
    %5 = arith.sitofp %4 : vector<8x128xi32> to vector<8x128xf32>
    %cst = arith.constant dense<0.000000e+00> : vector<128xf32>
    %6 = vector.multi_reduction <add>, %0, %cst [0] : vector<8x128xf32> to vector<128xf32>
    %7 = vector.shape_cast %6 : vector<128xf32> to vector<1x128xf32>
    %cst_1 = arith.constant 5.000000e-01 : f32
    %8 = vector.broadcast %cst_1 : f32 to vector<1x128xf32>
    %9 = arith.mulf %7, %8 : vector<1x128xf32>
    %10 = vector.broadcast %9 : vector<1x128xf32> to vector<8x128xf32>
    %11 = arith.subf %0, %10 : vector<8x128xf32>
    %12 = arith.mulf %11, %5 : vector<8x128xf32>
    %13 = arith.mulf %12, %12 : vector<8x128xf32>
    %cst_2 = arith.constant dense<0.000000e+00> : vector<128xf32>
    %14 = vector.multi_reduction <add>, %13, %cst_2 [0] : vector<8x128xf32> to vector<128xf32>
    %15 = vector.shape_cast %14 : vector<128xf32> to vector<1x128xf32>
    %cst_3 = arith.constant 5.000000e-01 : f32
    %16 = vector.broadcast %cst_3 : f32 to vector<1x128xf32>
    %17 = arith.mulf %15, %16 : vector<1x128xf32>
    %18 = vector.broadcast %9 : vector<1x128xf32> to vector<8x128xf32>
    %19 = arith.subf %0, %18 : vector<8x128xf32>
    %cst_4 = arith.constant 9.99999974E-6 : f32
    %20 = vector.broadcast %cst_4 : f32 to vector<1x128xf32>
    %21 = arith.addf %17, %20 : vector<1x128xf32>
    %22 = math.rsqrt %21 : vector<1x128xf32>
    %23 = vector.broadcast %22 : vector<1x128xf32> to vector<8x128xf32>
    %24 = arith.mulf %19, %23 : vector<8x128xf32>
    %c0_5 = arith.constant 0 : index
    %c0_6 = arith.constant 0 : index
    %c0_7 = arith.constant 0 : index
    %25 = vector.load %arg1[%c0_5, %c0_6, %c0_7] : memref<3x128x128xf32, #tpu.memory_space<vmem>>, vector<1x128x128xf32>
    %26 = vector.shape_cast %25 : vector<1x128x128xf32> to vector<128x128xf32>
    %cst_8 = arith.constant dense<0.000000e+00> : vector<8x128xf32>
    %27 = tpu.matmul %24, %26, %cst_8 {dimension_numbers = #tpu.dot_dimension_numbers<[1], [0], [0], [1], [0, 0, 1, 1], [], []>} : vector<8x128xf32>, vector<128x128xf32>, vector<8x128xf32> -> vector<8x128xf32>
    %c0_9 = arith.constant 0 : index
    %c0_10 = arith.constant 0 : index
    %c0_11 = arith.constant 0 : index
    %28 = vector.load %arg2[%c0_9, %c0_10, %c0_11] : memref<3x1x128xf32, #tpu.memory_space<vmem>>, vector<1x1x128xf32>
    %29 = vector.shape_cast %28 : vector<1x1x128xf32> to vector<1x128xf32>
    %30 = vector.broadcast %29 : vector<1x128xf32> to vector<8x128xf32>
    %31 = arith.addf %27, %30 : vector<8x128xf32>
    %32 = math.tanh %31 : vector<8x128xf32>
    %c1 = arith.constant 1 : index
    %c0_12 = arith.constant 0 : index
    %c0_13 = arith.constant 0 : index
    %33 = vector.load %arg1[%c1, %c0_12, %c0_13] : memref<3x128x128xf32, #tpu.memory_space<vmem>>, vector<1x128x128xf32>
    %34 = vector.shape_cast %33 : vector<1x128x128xf32> to vector<128x128xf32>
    %cst_14 = arith.constant dense<0.000000e+00> : vector<8x128xf32>
    %35 = tpu.matmul %32, %34, %cst_14 {dimension_numbers = #tpu.dot_dimension_numbers<[1], [0], [0], [1], [0, 0, 1, 1], [], []>} : vector<8x128xf32>, vector<128x128xf32>, vector<8x128xf32> -> vector<8x128xf32>
    %c1_15 = arith.constant 1 : index
    %c0_16 = arith.constant 0 : index
    %c0_17 = arith.constant 0 : index
    %36 = vector.load %arg2[%c1_15, %c0_16, %c0_17] : memref<3x1x128xf32, #tpu.memory_space<vmem>>, vector<1x1x128xf32>
    %37 = vector.shape_cast %36 : vector<1x1x128xf32> to vector<1x128xf32>
    %38 = vector.broadcast %37 : vector<1x128xf32> to vector<8x128xf32>
    %39 = arith.addf %35, %38 : vector<8x128xf32>
    %40 = math.tanh %39 : vector<8x128xf32>
    %c2 = arith.constant 2 : index
    %c0_18 = arith.constant 0 : index
    %c0_19 = arith.constant 0 : index
    %41 = vector.load %arg1[%c2, %c0_18, %c0_19] : memref<3x128x128xf32, #tpu.memory_space<vmem>>, vector<1x128x128xf32>
    %42 = vector.shape_cast %41 : vector<1x128x128xf32> to vector<128x128xf32>
    %cst_20 = arith.constant dense<0.000000e+00> : vector<8x128xf32>
    %43 = tpu.matmul %40, %42, %cst_20 {dimension_numbers = #tpu.dot_dimension_numbers<[1], [0], [0], [1], [0, 0, 1, 1], [], []>} : vector<8x128xf32>, vector<128x128xf32>, vector<8x128xf32> -> vector<8x128xf32>
    %c2_21 = arith.constant 2 : index
    %c0_22 = arith.constant 0 : index
    %c0_23 = arith.constant 0 : index
    %44 = vector.load %arg2[%c2_21, %c0_22, %c0_23] : memref<3x1x128xf32, #tpu.memory_space<vmem>>, vector<1x1x128xf32>
    %45 = vector.shape_cast %44 : vector<1x1x128xf32> to vector<1x128xf32>
    %46 = vector.broadcast %45 : vector<1x128xf32> to vector<8x128xf32>
    %47 = arith.addf %43, %46 : vector<8x128xf32>
    %48 = vector.extract_strided_slice %47 {offsets = [0, 2], sizes = [8, 1], strides = [1, 1]} : vector<8x128xf32> to vector<8x1xf32>
    %49 = vector.broadcast %48 : vector<8x1xf32> to vector<8x128xf32>
    %50 = arith.addf %47, %49 : vector<8x128xf32>
    %51 = vector.broadcast %48 : vector<8x1xf32> to vector<8x128xf32>
    %52 = arith.subf %50, %51 : vector<8x128xf32>
    %c0_24 = arith.constant 0 : index
    %c0_25 = arith.constant 0 : index
    %53 = vector.load %arg3[%c0_24, %c0_25] : memref<8x128xf32, #tpu.memory_space<vmem>>, vector<8x128xf32>
    tpu.vector_store %arg3[%c0_24, %c0_25], %52 {strides = array<i32>} : memref<8x128xf32, #tpu.memory_space<vmem>>, vector<8x128xf32>,
    return
  }
}

</mosaic_0001>

<bundles_post_ra>
// kernel: tpu_custom_call.1
= control target key start
LH: loop header
LB: loop body
LE: loop exit
PB: predicated region body
PF: predicated region fallthrough
CT: control target
= control target key end

     0   :  { %8 = vsyncpa [#allocation3], 0  ;;  %s810_s0 = inlined_call_operand.hbm [shape: f32[8,128], index: 0, kind: input, shape index: {}]   ;;  %s811_s1 = inlined_call_operand.hbm [shape: f32[3,128,128], index: 1, kind: input, shape index: {}]   ;;  %s812_s2 = inlined_call_operand.vmem [shape: f32[3,1,128], index: 2, kind: input, shape index: {}]   ;;  %s813_s3 = inlined_call_operand.hbm [shape: f32[8,128], index: 3, kind: output, shape index: {}]  }
   0x1   :  { %9 = vsyncpa [#allocation6], 0 }
   0x2   :  { %10 = vsyncpa [#allocation4], 0  ;;  %s698_s12 = smov [#allocation2]   ;;  %s699_s14 = smov [#allocation5]  }
   0x3   :  { %s17_s13 = sshll.u32 %s698_s12, 4  ;;  %s26_s15 = sshll.u32 %s699_s14, 4  ;;  %s18_s13 = int_to_ptr.vmem [resolvable:$true] %s17_s13  ;;  %s727_s15 = int_to_ptr.vmem [resolvable:$true] %s26_s15 }
   0x4   :  { %s626_s18 = scalar_lea.hbm %s810_s0, 128 }
   0x5   :  { %p627_p0 = scmp.ne.s32.totalorder %s810_s0, %s626_s18  ;;  %p630_p1 = scmp.lt.u32.totalorder %s626_s18, %s810_s0 }
   0x7   :  { %p632_p2 = pnand %p630_p1, %p627_p0 }
   0x9   :  { %635 = shalt.err (!%p632_p2)
}
   0xa   :  { %s636_s23 = scalar_lea.vmem %s18_s13, 128  ;;  %p641_p4 = scmp.lt.s32.totalorder %s18_s13, %s18_s13 }
   0xb   :  { %p637_p3 = scmp.ne.s32.totalorder %s18_s13, %s636_s23  ;;  %p642_p5 = scmp.lt.s32.totalorder %s636_s23, %s636_s23 }
   0xd   :  { %p643_p6 = por %p642_p5, %p641_p4 }
   0xf   :  { %p644_p7 = pnand %p643_p6, %p637_p3 }
  0x11   :  { %647 = shalt.err (!%p644_p7)
}
  0x12   :  { %20 = dma.hbm_to_vmem [thread:$0]  %s810_s0, 128, %s18_s13, [#allocation3]  }
  0x13   :  { %s648_s28 = scalar_lea.hbm %s811_s1, 6144 }
  0x14   :  { %p649_p8 = scmp.ne.s32.totalorder %s811_s1, %s648_s28  ;;  %p652_p9 = scmp.lt.u32.totalorder %s648_s28, %s811_s1 }
  0x16   :  { %p654_p10 = pnand %p652_p9, %p649_p8 }
  0x18   :  { %657 = shalt.err (!%p654_p10)
}
  0x19   :  { %s658_s6 = scalar_lea.vmem %s727_s15, 6144  ;;  %p663_p12 = scmp.lt.s32.totalorder %s727_s15, %s727_s15 }
  0x1a   :  { %p659_p11 = scmp.ne.s32.totalorder %s727_s15, %s658_s6  ;;  %p664_p13 = scmp.lt.s32.totalorder %s658_s6, %s658_s6 }
  0x1c   :  { %p665_p0 = por %p664_p13, %p663_p12 }
  0x1e   :  { %p666_p1 = pnand %p665_p0, %p659_p11 }
  0x20   :  { %669 = shalt.err (!%p666_p1)
}
  0x21   :  { %s700_s0 = smov 128   ;;  %s701_s7 = smov 8  }
  0x22   :  { %32 = dma.hbm_to_vmem [thread:$0]  %s811_s1, 6144, %s727_s15, [#allocation6], %s700_s0, %s700_s0, %s701_s7  }
  0x23   :  { %692 = dma.done.wait [#allocation3], 128  }
  0x24   :  { %693 = vsyncadd [#allocation3], 4294967168 }
  0x25   :  { %694 = dma.done.wait [#allocation6], 6144  }
  0x26   :  { %695 = vsyncadd [#allocation6], 4294961152  ;;  %v702_v0 = vmov 0.0|0.0   ;;  %vm703_vm0 = vmmov 0   ;;  %v704_v1 = vmov 0.0   ;;  %v67_v2 = vld [vmem:[#allocation5] sm:$0xff]  ;;  %v42_v20 = vlaneseq }
  0x27   :  { %538 = vmatprep.subr.bf16.mxu0 %v702_v0  ;;  %465 = vmatprep.mubr.msk.f32.mxu0 %vm703_vm0, %v704_v1  ;;  %v68_v3 = vld [vmem:[#allocation5 + $0x8] sm:$0xff]  ;;  %v69_v4 = vld [vmem:[#allocation5 + $0x10] sm:$0xff]  ;;  %v70_v6 = vld [vmem:[#allocation5 + $0x18] sm:$0xff]  ;;  %s706_s15 = smov [#allocation7]  }
  0x28   :  { %562 = vmatprep.subr.bf16.mxu1 %v702_v0  ;;  %500 = vmatprep.mubr.msk.f32.mxu1 %vm703_vm0, %v704_v1  ;;  %v539_v5 = vpack.c.bf16 %v68_v3, %v67_v2  ;;  %v542_v7 = vpack.c.bf16 %v70_v6, %v69_v4  ;;  %v71_v8 = vld [vmem:[#allocation5 + $0x20] sm:$0xff]  ;;  %v72_v9 = vld [vmem:[#allocation5 + $0x28] sm:$0xff]  ;;  %v41_v10 = vld [vmem:[#allocation2] sm:$0xff]  ;;  %v43_v29 = vshrl.u32 %v42_v20, 7  ;;  %s366_s16 = sshll.u32 %s706_s15, 4  ;;  %s367_s16 = int_to_ptr.vmem [resolvable:$true] %s366_s16 }
  0x29   :  { %v162_v11 = vld [vmem:[#allocation5 + $0x80] sm:$0xff]  ;;  %v47_v12 = vrot.slane %v41_v10, 4  ;;  %v163_v13 = vld [vmem:[#allocation5 + $0x88] sm:$0xff]  ;;  %v164_v14 = vld [vmem:[#allocation5 + $0x90] sm:$0xff]  ;;  %v545_v16 = vpack.c.bf16 %v72_v9, %v71_v8  ;;  %s670_s17 = scalar_lea.vmem %s367_s16, 128  ;;  %p675_p3 = scmp.lt.s32.totalorder %s367_s16, %s367_s16 }
  0x2a   :  { %540 = vmatpush3.bf16.msra.mxu0 %v539_v5  ;;  %v165_v15 = vld [vmem:[#allocation5 + $0x98] sm:$0xff]  ;;  %v563_v17 = vpack.c.bf16 %v163_v13, %v162_v11  ;;  %v73_v18 = vld [vmem:[#allocation5 + $0x30] sm:$0xff]  ;;  %v166_v24 = vld [vmem:[#allocation5 + $0xa0] sm:$0xff]  ;;  %vm44_vm1 = vcmp.lt.s32.totalorder %v43_v29, 2  ;;  %p671_p2 = scmp.ne.s32.totalorder %s367_s16, %s670_s17  ;;  %p676_p4 = scmp.lt.s32.totalorder %s670_s17, %s670_s17 }
  0x2b   :  { %541 = vmatprep.subr.bf16.mxu0 %v702_v0  ;;  %v74_v19 = vld [vmem:[#allocation5 + $0x38] sm:$0xff]  ;;  %v48_v21 = vadd.f32 %v47_v12, %v41_v10  ;;  %v566_v22 = vpack.c.bf16 %v165_v15, %v164_v14  ;;  %v167_v25 = vld [vmem:[#allocation5 + $0xa8] sm:$0xff]  ;;  %v75_v27 = vld [vmem:[#allocation5 + $0x40] sm:$0xff]  ;;  %v376_v44 = vsel %vm44_vm1, 1.0, %v704_v1 }
  0x2c   :  { %564 = vmatpush3.bf16.msra.mxu1 %v563_v17  ;;  %v548_v26 = vpack.c.bf16 %v74_v19, %v73_v18  ;;  %v76_v28 = vld [vmem:[#allocation5 + $0x48] sm:$0xff]  ;;  %v569_v31 = vpack.c.bf16 %v167_v25, %v166_v24  ;;  %v168_v33 = vld [vmem:[#allocation5 + $0xb0] sm:$0xff]  ;;  %v169_v34 = vld [vmem:[#allocation5 + $0xb8] sm:$0xff]  ;;  %p677_p5 = por %p676_p4, %p675_p3 }
  0x2d   :  { %v49_v23 = vrot.slane %v48_v21, 2  ;;  %565 = vmatprep.subr.bf16.mxu1 %v702_v0  ;;  %v551_v35 = vpack.c.bf16 %v76_v28, %v75_v27  ;;  %v77_v36 = vld [vmem:[#allocation5 + $0x50] sm:$0xff]  ;;  %v78_v37 = vld [vmem:[#allocation5 + $0x58] sm:$0xff]  ;;  %v572_v39 = vpack.c.bf16 %v169_v34, %v168_v33  ;;  %v170_v41 = vld [vmem:[#allocation5 + $0xc0] sm:$0xff] }
  0x2e   :  { %543 = vmatpush3.bf16.msra.mxu0 %v542_v7  ;;  %v171_v42 = vld [vmem:[#allocation5 + $0xc8] sm:$0xff]  ;;  %v554_v43 = vpack.c.bf16 %v78_v37, %v77_v36  ;;  %v79_v45 = vld [vmem:[#allocation5 + $0x60] sm:$0xff]  ;;  %v81_v51 = vld [vmem:[#allocation5 + $0x70] sm:$0xff]  ;;  %p678_p6 = pnand %p677_p5, %p671_p2 }
  0x2f   :  { %544 = vmatprep.subr.bf16.mxu0 %v702_v0  ;;  %v50_v30 = vadd.f32 %v49_v23, %v48_v21  ;;  %v80_v46 = vld [vmem:[#allocation5 + $0x68] sm:$0xff]  ;;  %v575_v48 = vpack.c.bf16 %v171_v42, %v170_v41  ;;  %v82_v52 = vld [vmem:[#allocation5 + $0x78] sm:$0xff]  ;;  %v172_v3 = vld [vmem:[#allocation5 + $0xd0] sm:$0xff] }
  0x30   :  { %567 = vmatpush3.bf16.msra.mxu1 %v566_v22  ;;  %v557_v50 = vpack.c.bf16 %v80_v46, %v79_v45  ;;  %v560_v55 = vpack.c.bf16 %v82_v52, %v81_v51  ;;  %v173_v4 = vld [vmem:[#allocation5 + $0xd8] sm:$0xff]  ;;  %v174_v6 = vld [vmem:[#allocation5 + $0xe0] sm:$0xff]  ;;  %v175_v7 = vld [vmem:[#allocation5 + $0xe8] sm:$0xff]  ;;  %v705_v45 = vmov 2  }
  0x31   :  { %v51_v32 = vrot.slane %v50_v30, 1  ;;  %568 = vmatprep.subr.bf16.mxu1 %v702_v0  ;;  %v578_v5 = vpack.c.bf16 %v173_v4, %v172_v3  ;;  %v581_v8 = vpack.c.bf16 %v175_v7, %v174_v6  ;;  %v176_v9 = vld [vmem:[#allocation5 + $0xf0] sm:$0xff]  ;;  %v258_v12 = vld [vmem:[#allocation5 + $0x100] sm:$0xff]  ;;  %v259_v13 = vld [vmem:[#allocation5 + $0x108] sm:$0xff]  ;;  %619 = vset.pattern.permute.xlu0 %v705_v45 }
  0x32   :  { %546 = vmatpush3.bf16.msra.mxu0 %v545_v16  ;;  %v260_v14 = vld [vmem:[#allocation5 + $0x110] sm:$0xff]  ;;  %v261_v15 = vld [vmem:[#allocation5 + $0x118] sm:$0xff]  ;;  %v262_v17 = vld [vmem:[#allocation5 + $0x120] sm:$0xff] }
  0x33   :  { %547 = vmatprep.subr.bf16.mxu0 %v702_v0  ;;  %v52_v38 = vadd.f32 %v51_v32, %v50_v30  ;;  %v590_v16 = vpack.c.bf16 %v261_v15, %v260_v14  ;;  %v263_v18 = vld [vmem:[#allocation5 + $0x128] sm:$0xff]  ;;  %v264_v20 = vld [vmem:[#allocation5 + $0x130] sm:$0xff]  ;;  %v265_v21 = vld [vmem:[#allocation5 + $0x138] sm:$0xff] }
  0x34   :  { %570 = vmatpush3.bf16.msra.mxu1 %v569_v31  ;;  %v593_v19 = vpack.c.bf16 %v263_v18, %v262_v17  ;;  %v596_v22 = vpack.c.bf16 %v265_v21, %v264_v20  ;;  %v266_v23 = vld [vmem:[#allocation5 + $0x140] sm:$0xff]  ;;  %v267_v24 = vld [vmem:[#allocation5 + $0x148] sm:$0xff]  ;;  %v268_v31 = vld [vmem:[#allocation5 + $0x150] sm:$0xff] }
  0x35   :  { %v53_v40 = vmul.f32 0.5, %v52_v38  ;;  %571 = vmatprep.subr.bf16.mxu1 %v702_v0  ;;  %v599_v25 = vpack.c.bf16 %v267_v24, %v266_v23  ;;  %v269_v32 = vld [vmem:[#allocation5 + $0x158] sm:$0xff]  ;;  %v270_v34 = vld [vmem:[#allocation5 + $0x160] sm:$0xff]  ;;  %v272_v37 = vld [vmem:[#allocation5 + $0x170] sm:$0xff] }
  0x36   :  { %549 = vmatpush3.bf16.msra.mxu0 %v548_v26  ;;  %v377_v26 = vld [vmem:[%s812_s2] ss:$0 sm:$0xff]  ;;  %v602_v33 = vpack.c.bf16 %v269_v32, %v268_v31  ;;  %v381_v46 = vld [vmem:[%s812_s2 + $0x2] ss:$0 sm:$0xff] }
  0x37   :  { %550 = vmatprep.subr.bf16.mxu0 %v702_v0  ;;  %v54_v47 = vsub.f32 %v41_v10, %v53_v40  ;;  %v177_v10 = vld [vmem:[#allocation5 + $0xf8] sm:$0xff] }
  0x38   :  { %573 = vmatpush3.bf16.msra.mxu1 %v572_v39  ;;  %v584_v11 = vpack.c.bf16 %v177_v10, %v176_v9  ;;  %v273_v38 = vld [vmem:[#allocation5 + $0x178] sm:$0xff] }
  0x39   :  { %v55_v49 = vmul.f32 %v376_v44, %v54_v47  ;;  %574 = vmatprep.subr.bf16.mxu1 %v702_v0  ;;  %v608_v39 = vpack.c.bf16 %v273_v38, %v272_v37  ;;  %v379_v40 = vld [vmem:[%s812_s2 + $0x1] ss:$0 sm:$0xff] }
  0x3a   :  { %552 = vmatpush3.bf16.msra.mxu0 %v551_v35  ;;  %v271_v35 = vld [vmem:[#allocation5 + $0x168] sm:$0xff] }
  0x3b   :  { %553 = vmatprep.subr.bf16.mxu0 %v702_v0  ;;  %v56_v53 = vmul.f32 %v55_v49, %v55_v49  ;;  %v605_v36 = vpack.c.bf16 %v271_v35, %v270_v34 }
  0x3c   :  { %576 = vmatpush3.bf16.msra.mxu1 %v575_v48 }
  0x3d   :  { %v57_v54 = vrot.slane %v56_v53, 4  ;;  %577 = vmatprep.subr.bf16.mxu1 %v702_v0 }
  0x3e   :  { %555 = vmatpush3.bf16.msra.mxu0 %v554_v43 }
  0x3f   :  { %556 = vmatprep.subr.bf16.mxu0 %v702_v0  ;;  %v58_v56 = vadd.f32 %v57_v54, %v56_v53 }
  0x40   :  { %579 = vmatpush3.bf16.msra.mxu1 %v578_v5 }
  0x41   :  { %v59_v57 = vrot.slane %v58_v56, 2  ;;  %580 = vmatprep.subr.bf16.mxu1 %v702_v0 }
  0x42   :  { %558 = vmatpush3.bf16.msra.mxu0 %v557_v50 }
  0x43   :  { %559 = vmatprep.subr.bf16.mxu0 %v702_v0  ;;  %v60_v58 = vadd.f32 %v59_v57, %v58_v56 }
  0x44   :  { %582 = vmatpush3.bf16.msra.mxu1 %v581_v8 }
  0x45   :  { %v61_v59 = vrot.slane %v60_v58, 1  ;;  %583 = vmatprep.subr.bf16.mxu1 %v702_v0 }
  0x46   :  { %561 = vmatpush3.bf16.msra.mxu0 %v560_v55 }
  0x47   :  { %586 = vmatprep.subr.bf16.mxu0 %v702_v0  ;;  %v62_v60 = vadd.f32 %v61_v59, %v60_v58 }
  0x48   :  { %585 = vmatpush3.bf16.msra.mxu1 %v584_v11 }
  0x49   :  { %v63_v61 = vmul.f32 0.5, %v62_v60 }
  0x4b   :  { %v64_v62 = vadd.f32 1e-05, %v63_v61 }
  0x4d   :  { %620 = vrsqrt.f32 %v64_v62 }
  0x57   :  { %v621_v63 = vpop.eup %620 }
  0x58   :  { %v66_v2 = vmul.f32 %v621_v63, %v54_v47 }
  0x5a   :  { %466 = vmatmul.mubr.f32.vlgmr.msra.gmra.mrb[0].mxu0 %v66_v2 }
  0x5b   :  { %535 = vmatprep.mubr.msk.f32.mxu0 %vm703_vm0, %v704_v1  ;;  %v587_v1 = vpack.c.bf16 %v259_v13, %v258_v12 }
  0x5d   :  { %588 = vmatpush3.bf16.msra.mxu0 %v587_v1 }
  0x5e   :  { %589 = vmatprep.subr.bf16.mxu0 %v702_v0 }
  0x61   :  { %591 = vmatpush3.bf16.msra.mxu0 %v590_v16 }
  0x62   :  { %592 = vmatprep.subr.bf16.mxu0 %v702_v0 }
  0x65   :  { %594 = vmatpush3.bf16.msra.mxu0 %v593_v19 }
  0x66   :  { %595 = vmatprep.subr.bf16.mxu0 %v702_v0 }
  0x69   :  { %597 = vmatpush3.bf16.msra.mxu0 %v596_v22 }
  0x6a   :  { %598 = vmatprep.subr.bf16.mxu0 %v702_v0 }
  0x6d   :  { %600 = vmatpush3.bf16.msra.mxu0 %v599_v25 }
  0x6e   :  { %601 = vmatprep.subr.bf16.mxu0 %v702_v0 }
  0x71   :  { %603 = vmatpush3.bf16.msra.mxu0 %v602_v33 }
  0x72   :  { %604 = vmatprep.subr.bf16.mxu0 %v702_v0 }
  0x75   :  { %606 = vmatpush3.bf16.msra.mxu0 %v605_v36 }
  0x76   :  { %607 = vmatprep.subr.bf16.mxu0 %v702_v0 }
  0x79   :  { %609 = vmatpush3.bf16.msra.mxu0 %v608_v39 }
 0x12d   :  { %v156_v27 = vpop.f32.mrb[0].mxu0 }
 0x12e   :  { %v157_v28 = vadd.f32 %v377_v26, %v156_v27  ;;  %v467_v29 = vpop.f32.mrb[1].mxu0 }
 0x130   :  { %622 = vtanh.f32 %v157_v28 }
 0x13a   :  { %v623_v30 = vpop.eup %622 }
 0x13b   :  { %501 = vmatmul.mubr.f32.vlgmr.msra.gmra.mrb[0].mxu1 %v623_v30 }
 0x20e   :  { %v252_v41 = vpop.f32.mrb[0].mxu1 }
 0x20f   :  { %v253_v42 = vadd.f32 %v379_v40, %v252_v41  ;;  %v502_v43 = vpop.f32.mrb[1].mxu1 }
 0x211   :  { %624 = vtanh.f32 %v253_v42 }
 0x21b   :  { %v625_v44 = vpop.eup %624 }
 0x21c   :  { %536 = vmatmul.mubr.f32.vlgmr.msra.gmra.mrb[2].mxu0 %v625_v44 }
 0x2ef   :  { %v348_v47 = vpop.f32.mrb[2].mxu0 }
 0x2f0   :  { %v349_v48 = vadd.f32 %v381_v46, %v348_v47  ;;  %v537_v0 = vpop.f32.mrb[3].mxu0 }
 0x2f2   :  { %354 = vperm.xlu0 %619, %v349_v48  }
 0x371   :  { %v355_v49 = vpop.permute.xlu0 %354 }
 0x372   :  { %v357_v50 = vadd.f32 %v355_v49, %v349_v48 }
 0x374   :  { %v358_v51 = vsub.f32 %v357_v50, %v355_v49 }
 0x376   :  { %359 = vst [vmem:[#allocation7] sm:$0xff] %v358_v51 }
 0x377   :  { %681 = shalt.err (!%p678_p6)
}
 0x378   :  { %s682_s19 = scalar_lea.hbm %s813_s3, 128 }
 0x379   :  { %p683_p7 = scmp.ne.s32.totalorder %s813_s3, %s682_s19  ;;  %p686_p8 = scmp.lt.u32.totalorder %s682_s19, %s813_s3 }
 0x37b   :  { %p688_p9 = pnand %p686_p8, %p683_p7 }
 0x37d   :  { %691 = shalt.err (!%p688_p9)
}
 0x37e   :  { %369 = dma.vmem_to_hbm [thread:$0]  %s367_s16, 128, %s813_s3, [#allocation4]  }
 0x37f   :  { %696 = dma.done.wait [#allocation4], 128  }
 0x380   :  { %697 = vsyncadd [#allocation4], 4294967168 }
 0x381   :  { %373 = vsyncpa [#allocation3], 1 }
 0x382   :  { %374 = vsyncpa [#allocation6], 1 }
 0x383   :  { %375 = vsyncpa [#allocation4], 1 }

</bundles_post_ra>
